<compile_context>
chip_gen: v7x
topology: tpu7x:2x2x1
jax: 0.10.0
libtpu: 0.0.40
codegen_flags: <defaults>
</compile_context>

<pallas_src>
import functools
import math

import jax
import jax.numpy as jnp
from jax.experimental import pallas as pl
from jax.experimental.pallas import tpu as pltpu


def _round_up(a: int, b: int) -> int:
    return ((a + b - 1) // b) * b


# --------------------------- LayerNormalization ------------------------------
def _layernorm_kernel(alpha_ref, bias_ref, x_ref, o_ref, *, eps: float):
    # x_ref: (row_tile, H) block in VMEM
    x = x_ref[...].astype(jnp.float32)
    n = x.shape[-1]

    mean = jnp.mean(x, axis=-1, keepdims=True)
    diff = x - mean
    # torch.std default is the unbiased estimator (divide by N-1)
    var = jnp.sum(diff * diff, axis=-1, keepdims=True) / jnp.float32(n - 1)
    std = jnp.sqrt(var)

    # eps is added to std (not variance), exactly as in the PyTorch module.
    # One reciprocal per row on the EUP instead of H divides per row on the VPU.
    inv = pl.reciprocal(std + jnp.float32(eps), approx=False)      # (rows, 1)
    scale = alpha_ref[0] * inv                                     # fused per-row scale
    o_ref[...] = (diff * scale + bias_ref[0]).astype(o_ref.dtype)


def layer_normalization(x, alpha, bias, eps: float = 1e-6):
    """Custom LayerNormalization (scalar alpha/bias, unbiased std, eps on std)."""
    orig_shape = x.shape
    H = orig_shape[-1]
    rows = 1
    for d in orig_shape[:-1]:
        rows *= d
    x2 = x.reshape(rows, H)

    # Large bandwidth-friendly row tile (~2 MiB f32 block), multiple of 8, >= 8.
    # 2 MiB/block * (2 in + 2 out double buffers) = 8 MiB in flight -> fits the
    # 16 MiB scoped default on v5e and leaves slack on v6e/v7x.
    row_tile = (2 * 1024 * 1024) // max(H * 4, 1)
    row_tile = max(8, min(1024, (row_tile // 8) * 8))
    row_tile = min(row_tile, _round_up(rows, 8))

    # Pad rows to a tile multiple instead of shrinking the tile (never < 8 rows).
    rows_p = _round_up(rows, row_tile)
    if rows_p != rows:
        x2 = jnp.pad(x2, ((0, rows_p - rows), (0, 0)))

    kernel = functools.partial(_layernorm_kernel, eps=eps)
    out = pl.pallas_call(
        kernel,
        out_shape=jax.ShapeDtypeStruct((rows_p, H), x.dtype),
        grid_spec=pltpu.PrefetchScalarGridSpec(
            num_scalar_prefetch=0,
            grid=(rows_p // row_tile,),
            in_specs=[
                # scalar params live in SMEM, whole array, same for every tile
                pl.BlockSpec(memory_space=pltpu.MemorySpace.SMEM),
                pl.BlockSpec(memory_space=pltpu.MemorySpace.SMEM),
                pl.BlockSpec((row_tile, H), lambda i: (i, 0)),
            ],
            out_specs=pl.BlockSpec((row_tile, H), lambda i: (i, 0)),
        ),
        compiler_params=pltpu.CompilerParams(
            dimension_semantics=("parallel",),
        ),
    )(alpha.astype(jnp.float32), bias.astype(jnp.float32), x2)

    if rows_p != rows:
        out = out[:rows]
    return out.reshape(orig_shape)


# --------------------------------- MatMul ------------------------------------
def _matmul_kernel(*refs, activation, has_residual):
    if has_residual:
        x_ref, w_ref, r_ref, o_ref, acc_ref = refs
    else:
        x_ref, w_ref, o_ref, acc_ref = refs
        r_ref = None

    @pl.when(pl.program_id(2) == 0)
    def _():
        acc_ref[...] = jnp.zeros_like(acc_ref)

    acc_ref[...] += jnp.dot(
        x_ref[...], w_ref[...], preferred_element_type=jnp.float32
    )

    @pl.when(pl.program_id(2) == pl.num_programs(2) - 1)
    def _():
        acc = acc_ref[...]
        if activation == "relu":
            acc = jnp.maximum(acc, 0.0)
        if r_ref is not None:
            acc = acc + r_ref[...].astype(jnp.float32)   # fused residual add
        o_ref[...] = acc.astype(o_ref.dtype)


def matmul(x, w, residual=None, activation=None, tm=256, tn=256, tk=512):
    """out = act(x @ w) [+ residual], tiled MXU matmul with f32 accumulator."""
    M, K = x.shape
    Kw, N = w.shape
    assert K == Kw
    out_dtype = x.dtype

    # Tile choices obey the (8,128) rule: either divisible (256/512) or full dim.
    if M <= tm:
        tm = _round_up(M, 8)
    if N <= tn:
        tn = N
    if K <= tk:
        tk = K
    Mp, Np, Kp = _round_up(M, tm), _round_up(N, tn), _round_up(K, tk)

    xp = jnp.pad(x, ((0, Mp - M), (0, Kp - K))) if (Mp != M or Kp != K) else x
    wp = jnp.pad(w, ((0, Kp - K), (0, Np - N))) if (Kp != K or Np != N) else w

    has_residual = residual is not None
    inputs = [xp, wp]
    in_specs = [
        pl.BlockSpec((tm, tk), lambda i, j, k: (i, k)),
        pl.BlockSpec((tk, tn), lambda i, j, k: (k, j)),
    ]
    if has_residual:
        rp = residual
        if Mp != M or Np != N:
            rp = jnp.pad(residual, ((0, Mp - M), (0, Np - N)))
        inputs.append(rp)
        in_specs.append(pl.BlockSpec((tm, tn), lambda i, j, k: (i, j)))

    kernel = functools.partial(
        _matmul_kernel, activation=activation, has_residual=has_residual
    )
    out = pl.pallas_call(
        kernel,
        out_shape=jax.ShapeDtypeStruct((Mp, Np), out_dtype),
        grid_spec=pltpu.PrefetchScalarGridSpec(
            num_scalar_prefetch=0,
            grid=(Mp // tm, Np // tn, Kp // tk),
            in_specs=in_specs,
            out_specs=pl.BlockSpec((tm, tn), lambda i, j, k: (i, j)),
            scratch_shapes=[pltpu.VMEM((tm, tn), jnp.float32)],
        ),
        compiler_params=pltpu.CompilerParams(
            dimension_semantics=("parallel", "parallel", "arbitrary"),
        ),
    )(*inputs)

    if Mp != M or Np != N:
        out = out[:M, :N]
    return out


# ------------------------------- Attention ------------------------------------
def _attention_kernel(q_ref, k_ref, v_ref, mb_ref, o_ref, *, scale: float):
    # One (batch, head) slice per grid step; full S x S scores in VMEM.
    q = q_ref[0].astype(jnp.float32)                       # (S, Dk)
    k = k_ref[0].astype(jnp.float32)                       # (S, Dk)
    v = v_ref[0].astype(jnp.float32)                       # (S, Dk)

    s = jnp.dot(q, k.T, preferred_element_type=jnp.float32) * jnp.float32(scale)
    s = s + mb_ref[0]                                      # additive mask bias (1, S)

    m = jnp.max(s, axis=-1, keepdims=True)
    p = jnp.exp(s - m)
    l = jnp.sum(p, axis=-1, keepdims=True)
    ctx = jnp.dot(p, v, preferred_element_type=jnp.float32)
    o_ref[0] = (ctx * pl.reciprocal(l, approx=False)).astype(o_ref.dtype)


def multi_head_attention(q3, k3, v3, mask_bias, num_heads):
    """q3/k3/v3: (B, S, D); mask_bias: (B, 1, S) additive f32 (0 or -inf)."""
    B, S, D = q3.shape
    dk = D // num_heads
    BH = B * num_heads

    def split_heads(t):
        return t.reshape(B, S, num_heads, dk).transpose(0, 2, 1, 3).reshape(BH, S, dk)

    qh, kh, vh = split_heads(q3), split_heads(k3), split_heads(v3)
    scale = 1.0 / math.sqrt(dk)

    kernel = functools.partial(_attention_kernel, scale=scale)
    ctx = pl.pallas_call(
        kernel,
        out_shape=jax.ShapeDtypeStruct((BH, S, dk), q3.dtype),
        grid_spec=pltpu.PrefetchScalarGridSpec(
            num_scalar_prefetch=0,
            grid=(BH,),
            in_specs=[
                pl.BlockSpec((1, S, dk), lambda i: (i, 0, 0)),
                pl.BlockSpec((1, S, dk), lambda i: (i, 0, 0)),
                pl.BlockSpec((1, S, dk), lambda i: (i, 0, 0)),
                pl.BlockSpec((1, 1, S), lambda i, nh=num_heads: (i // nh, 0, 0)),
            ],
            out_specs=pl.BlockSpec((1, S, dk), lambda i: (i, 0, 0)),
        ),
        compiler_params=pltpu.CompilerParams(
            dimension_semantics=("parallel",),
        ),
    )(qh, kh, vh, mask_bias)

    return ctx.reshape(B, num_heads, S, dk).transpose(0, 2, 1, 3).reshape(B, S, D)


# ------------------------------ EncoderBlock -----------------------------------
def encoder_block(x, src_mask, params, num_heads, eps: float = 1e-6):
    """Pre-norm encoder block:
        x = x + MHA(LN(x), LN(x), LN(x), mask)
        x = x + FFN(LN(x))
    Dropout is identity (inference / p=0).
    """
    # TODO(synk): dropout implemented as identity (inference mode); stochastic
    # training-time dropout would need pltpu.prng_* masks.
    # TODO(synk): LayerNorm is still a standalone pass; fusing it onto the A-tile
    # inside the consumer matmul would save one HBM roundtrip of the activations.
    B, S, D = x.shape
    rows = B * S
    x2 = x.reshape(rows, D)

    # (B, 1, 1, S) keep/mask -> additive bias (B, 1, S), broadcast over heads & queries
    mask2 = src_mask.reshape(B, 1, S)
    mask_bias = jnp.where(mask2 == 0, -jnp.inf, 0.0).astype(jnp.float32)

    # ---- residual connection 1: x + self_attention(norm(x)) ----
    xn = layer_normalization(x2, params["alpha1"], params["bias1"], eps)
    wqkv = jnp.concatenate([params["wq"], params["wk"], params["wv"]], axis=1)
    qkv = matmul(xn, wqkv)                               # (rows, 3D), reads xn once
    q3 = qkv[:, :D].reshape(B, S, D)
    k3 = qkv[:, D:2 * D].reshape(B, S, D)
    v3 = qkv[:, 2 * D:].reshape(B, S, D)
    ctx = multi_head_attention(q3, k3, v3, mask_bias, num_heads)
    x2 = matmul(ctx.reshape(rows, D), params["wo"], residual=x2)   # fused + residual

    # ---- residual connection 2: x + feed_forward(norm(x)) ----
    xn2 = layer_normalization(x2, params["alpha2"], params["bias2"], eps)
    hdn = matmul(xn2, params["w1"], activation="relu")
    x2 = matmul(hdn, params["w2"], residual=x2)                    # fused + residual

    return x2.reshape(B, S, D)


# ------------------------------- Reference -------------------------------------
def _encoder_block_ref(x, src_mask, params, num_heads, eps: float = 1e-6):
    def ln(t, alpha, bias):
        mean = jnp.mean(t, axis=-1, keepdims=True)
        var = jnp.sum((t - mean) ** 2, axis=-1, keepdims=True) / (t.shape[-1] - 1)
        std = jnp.sqrt(var)
        return alpha[0] * (t - mean) / (std + eps) + bias[0]

    B, S, D = x.shape
    dk = D // num_heads

    def mha(t):
        q, k, v = t @ params["wq"], t @ params["wk"], t @ params["wv"]

        def heads(u):
            return u.reshape(B, S, num_heads, dk).transpose(0, 2, 1, 3)

        q, k, v = heads(q), heads(k), heads(v)
        scores = (q @ k.transpose(0, 1, 3, 2)) / math.sqrt(dk)
        scores = jnp.where(src_mask == 0, -jnp.inf, scores)
        attn = jax.nn.softmax(scores, axis=-1)
        ctx = (attn @ v).transpose(0, 2, 1, 3).reshape(B, S, D)
        return ctx @ params["wo"]

    x = x + mha(ln(x, params["alpha1"], params["bias1"]))
    x = x + jax.nn.relu(ln(x, params["alpha2"], params["bias2"]) @ params["w1"]) @ params["w2"]
    return x


if __name__ == "__main__":
    # Full-precision reference matmuls so the comparison is meaningful.
    jax.config.update("jax_default_matmul_precision", "highest")

    key = jax.random.PRNGKey(0)
    B, S, D, H, DFF = 2, 8, 32, 4, 64
    keys = jax.random.split(key, 7)

    x = jax.random.normal(keys[0], (B, S, D), dtype=jnp.float32)
    s_in = 1.0 / math.sqrt(D)
    params = dict(
        wq=jax.random.normal(keys[1], (D, D), jnp.float32) * s_in,
        wk=jax.random.normal(keys[2], (D, D), jnp.float32) * s_in,
        wv=jax.random.normal(keys[3], (D, D), jnp.float32) * s_in,
        wo=jax.random.normal(keys[4], (D, D), jnp.float32) * s_in,
        w1=jax.random.normal(keys[5], (D, DFF), jnp.float32) * s_in,
        w2=jax.random.normal(keys[6], (DFF, D), jnp.float32) * (1.0 / math.sqrt(DFF)),
        alpha1=jnp.ones((1,), jnp.float32),
        bias1=jnp.zeros((1,), jnp.float32),
        alpha2=jnp.ones((1,), jnp.float32),
        bias2=jnp.zeros((1,), jnp.float32),
    )

    # padding mask (1 = keep, 0 = mask): last token of batch 0 masked out
    src_mask = jnp.ones((B, 1, 1, S), dtype=jnp.int32).at[0, 0, 0, S - 1].set(0)

    out = encoder_block(x, src_mask, params, num_heads=H)
    out = jax.block_until_ready(out)

    ref = _encoder_block_ref(x, src_mask, params, num_heads=H)

    assert out.shape == x.shape and out.dtype == x.dtype
    max_err = float(jnp.max(jnp.abs(out - ref)))
    assert jnp.allclose(out, ref, atol=2e-4, rtol=2e-4), max_err

    print("KERNEL_OK")
</pallas_src>

<mosaic_0001>
module attributes {stable_mosaic.version = 11 : i64} {
  func.func @_layernorm_kernel(%arg0: i32, %arg1: memref<1xf32, #tpu.memory_space<smem>>, %arg2: memref<1xf32, #tpu.memory_space<smem>>, %arg3: memref<16x32xf32, #tpu.memory_space<vmem>>, %arg4: memref<16x32xf32, #tpu.memory_space<vmem>>) attributes {dimension_semantics = [#tpu.dimension_semantics<parallel>], iteration_bounds = array<i64: 1>, scalar_prefetch = 0 : i64, scratch_operands = 0 : i64, tpu.core_type = #tpu.core_type<tc>, window_params = [{transform_indices = @transform_0, window_bounds = array<i64: 1>}, {transform_indices = @transform_1, window_bounds = array<i64: 1>}, {transform_indices = @transform_2, window_bounds = array<i64: 16, 32>}, {transform_indices = @transform_3, window_bounds = array<i64: 16, 32>}]} {
    %c0 = arith.constant 0 : index
    %c0_0 = arith.constant 0 : index
    %0 = vector.load %arg3[%c0, %c0_0] : memref<16x32xf32, #tpu.memory_space<vmem>>, vector<16x32xf32>
    %cst = arith.constant dense<0.000000e+00> : vector<16xf32>
    %1 = vector.multi_reduction <add>, %0, %cst [1] : vector<16x32xf32> to vector<16xf32>
    %2 = vector.shape_cast %1 : vector<16xf32> to vector<16x1xf32>
    %cst_1 = arith.constant 3.200000e+01 : f32
    %3 = vector.broadcast %cst_1 : f32 to vector<16x1xf32>
    %4 = arith.divf %2, %3 : vector<16x1xf32>
    %5 = vector.broadcast %4 : vector<16x1xf32> to vector<16x32xf32>
    %6 = arith.subf %0, %5 : vector<16x32xf32>
    %7 = arith.mulf %6, %6 : vector<16x32xf32>
    %cst_2 = arith.constant dense<0.000000e+00> : vector<16xf32>
    %8 = vector.multi_reduction <add>, %7, %cst_2 [1] : vector<16x32xf32> to vector<16xf32>
    %9 = vector.shape_cast %8 : vector<16xf32> to vector<16x1xf32>
    %cst_3 = arith.constant 3.100000e+01 : f32
    %10 = vector.broadcast %cst_3 : f32 to vector<16x1xf32>
    %11 = arith.divf %9, %10 : vector<16x1xf32>
    %12 = math.sqrt %11 : vector<16x1xf32>
    %cst_4 = arith.constant 9.99999997E-7 : f32
    %13 = vector.broadcast %cst_4 : f32 to vector<16x1xf32>
    %14 = arith.addf %12, %13 : vector<16x1xf32>
    %15 = tpu.reciprocal %14 : vector<16x1xf32> -> vector<16x1xf32>
    %c0_5 = arith.constant 0 : index
    %16 = memref.load %arg1[%c0_5] : memref<1xf32, #tpu.memory_space<smem>>
    %17 = vector.broadcast %16 : f32 to vector<16x1xf32>
    %18 = arith.mulf %17, %15 : vector<16x1xf32>
    %19 = vector.broadcast %18 : vector<16x1xf32> to vector<16x32xf32>
    %20 = arith.mulf %6, %19 : vector<16x32xf32>
    %c0_6 = arith.constant 0 : index
    %21 = memref.load %arg2[%c0_6] : memref<1xf32, #tpu.memory_space<smem>>
    %22 = vector.broadcast %21 : f32 to vector<16x32xf32>
    %23 = arith.addf %20, %22 : vector<16x32xf32>
    %c0_7 = arith.constant 0 : index
    %c0_8 = arith.constant 0 : index
    %24 = vector.load %arg4[%c0_7, %c0_8] : memref<16x32xf32, #tpu.memory_space<vmem>>, vector<16x32xf32>
    tpu.vector_store %arg4[%c0_7, %c0_8], %23 {strides = array<i32>} : memref<16x32xf32, #tpu.memory_space<vmem>>, vector<16x32xf32>,
    return
  }
  func.func @transform_0(%arg0: i32) -> i32 {
    %c0_i32 = arith.constant 0 : i32
    %c0_i32_0 = arith.constant 0 : i32
    return %c0_i32 : i32
  }
  func.func @transform_1(%arg0: i32) -> i32 {
    %c0_i32 = arith.constant 0 : i32
    %c0_i32_0 = arith.constant 0 : i32
    return %c0_i32 : i32
  }
  func.func @transform_2(%arg0: i32) -> (i32, i32) {
    %c0_i32 = arith.constant 0 : i32
    %c0_i32_0 = arith.constant 0 : i32
    return %arg0, %c0_i32 : i32, i32
  }
  func.func @transform_3(%arg0: i32) -> (i32, i32) {
    %c0_i32 = arith.constant 0 : i32
    %c0_i32_0 = arith.constant 0 : i32
    return %arg0, %c0_i32 : i32, i32
  }
}

</mosaic_0001>

<bundles_post_ra>
// kernel: tpu_custom_call.1
= control target key start
LH: loop header
LB: loop body
LE: loop exit
PB: predicated region body
PF: predicated region fallthrough
CT: control target
= control target key end

     0   :  { %10 = vsyncpa [#allocation5], 0  ;;  %s229_s0 = inlined_call_operand.<no memory space> [shape: f32[1], index: 0, kind: input, shape index: {}]   ;;  %s230_s1 = inlined_call_operand.<no memory space> [shape: f32[1], index: 1, kind: input, shape index: {}]   ;;  %s231_s2 = inlined_call_operand.hbm [shape: f32[16,32], index: 2, kind: input, shape index: {}]   ;;  %s232_s3 = inlined_call_operand.hbm [shape: f32[16,32], index: 3, kind: output, shape index: {}]  }
   0x1   :  { %11 = vsyncpa [#allocation6], 0  ;;  %s163_s12 = smov [#allocation4]   ;;  %s115_s16 = scalar_lea.hbm %s231_s2, 256 }
   0x2   :  { %s21_s13 = sshll.u32 %s163_s12, 4  ;;  %p116_p0 = scmp.ne.s32.totalorder %s231_s2, %s115_s16  ;;  %s22_s13 = int_to_ptr.vmem [resolvable:$true] %s21_s13 }
   0x3   :  { %p119_p1 = scmp.lt.u32.totalorder %s115_s16, %s231_s2 }
   0x5   :  { %p121_p2 = pnand %p119_p1, %p116_p0 }
   0x7   :  { %124 = shalt.err (!%p121_p2)
}
   0x8   :  { %s125_s21 = scalar_lea.vmem %s22_s13, 256  ;;  %p130_p4 = scmp.lt.s32.totalorder %s22_s13, %s22_s13 }
   0x9   :  { %p126_p3 = scmp.ne.s32.totalorder %s22_s13, %s125_s21  ;;  %p131_p5 = scmp.lt.s32.totalorder %s125_s21, %s125_s21 }
   0xb   :  { %p132_p6 = por %p131_p5, %p130_p4 }
   0xd   :  { %p133_p7 = pnand %p132_p6, %p126_p3 }
   0xf   :  { %136 = shalt.err (!%p133_p7)
}
  0x10   :  { %s164_s22 = smov 128   ;;  %s165_s23 = smov 8  }
  0x11   :  { %27 = dma.hbm_to_vmem [thread:$0]  %s231_s2, 256, %s22_s13, [#allocation5], %s164_s22, %s164_s22, %s165_s23  }
  0x12   :  { %159 = dma.done.wait [#allocation5], 256  }
  0x13   :  { %160 = vsyncadd [#allocation5], 4294967040  ;;  %vm33_vm0 = vcmask 261120   ;;  %v31_v0 = vld [vmem:[#allocation4] sm:$0xff]  ;;  %v32_v1 = vld [vmem:[#allocation4 + $0x8] sm:$0xff]  ;;  %v75_v30 = vstv %s229_s0  ;;  %v81_v33 = vstv %s230_s1  ;;  %s166_s29 = smov [#allocation7]  }
  0x14   :  { %v34_v2 = vsel %vm33_vm0, %v31_v0, 0.0  ;;  %v37_v3 = vsel %vm33_vm0, %v32_v1, 0.0  ;;  %s91_s30 = sshll.u32 %s166_s29, 4  ;;  %s92_s30 = int_to_ptr.vmem [resolvable:$true] %s91_s30 }
  0x15   :  { %35 = vadd.xlane.f32.xlu0 %v34_v2  ;;  %s137_s0 = scalar_lea.vmem %s92_s30, 256  ;;  %p142_p9 = scmp.lt.s32.totalorder %s92_s30, %s92_s30 }
  0x16   :  { %p138_p8 = scmp.ne.s32.totalorder %s92_s30, %s137_s0  ;;  %p143_p10 = scmp.lt.s32.totalorder %s137_s0, %s137_s0 }
  0x18   :  { %p144_p11 = por %p143_p10, %p142_p9 }
  0x19   :  { %38 = vadd.xlane.f32.xlu0 %v37_v3 }
  0x1a   :  { %p145_p12 = pnand %p144_p11, %p138_p8 }
  0xa2   :  { %v36_v4 = vpop.xlane.xlu0 %35 }
  0xa3   :  { %v41_v5 = vmul.f32 0.03125, %v36_v4 }
  0xa5   :  { %v43_v6 = vsub.f32 %v31_v0, %v41_v5 }
  0xa6   :  { %v39_v7 = vpop.xlane.xlu0 %38 }
  0xa7   :  { %v42_v8 = vmul.f32 0.03125, %v39_v7  ;;  %v45_v9 = vmul.f32 %v43_v6, %v43_v6 }
  0xa9   :  { %v44_v10 = vsub.f32 %v32_v1, %v42_v8  ;;  %v47_v11 = vsel %vm33_vm0, %v45_v9, 0.0 }
  0xaa   :  { %48 = vadd.xlane.f32.xlu1 %v47_v11 }
  0xab   :  { %v46_v12 = vmul.f32 %v44_v10, %v44_v10 }
  0xad   :  { %v50_v13 = vsel %vm33_vm0, %v46_v12, 0.0 }
  0xae   :  { %51 = vadd.xlane.f32.xlu1 %v50_v13 }
 0x137   :  { %v49_v14 = vpop.xlane.xlu1 %48 }
 0x138   :  { %v54_v15 = vmul.f32 0.032258064, %v49_v14 }
 0x13a   :  { %107 = vrsqrt.f32 %v54_v15  ;;  %vm58_vm1 = vcmp.eq.f32.partialorder %v54_v15, inf  ;;  %v61_v20 = vand.u32 2147483648, %v54_v15  ;;  %vm60_vm2 = vcmp.eq.f32.partialorder %v54_v15, 0.0 }
 0x13b   :  { %v52_v16 = vpop.xlane.xlu1 %51 }
 0x13c   :  { %v55_v17 = vmul.f32 0.032258064, %v52_v16 }
 0x13e   :  { %109 = vrsqrt.f32 %v55_v17  ;;  %vm65_vm3 = vcmp.eq.f32.partialorder %v55_v17, inf  ;;  %v68_v26 = vand.u32 2147483648, %v55_v17  ;;  %vm67_vm4 = vcmp.eq.f32.partialorder %v55_v17, 0.0 }
 0x144   :  { %v108_v18 = vpop.eup %107 }
 0x145   :  { %v57_v19 = vmul.f32 %v108_v18, %v54_v15 }
 0x147   :  { %v59_v21 = vsel %vm58_vm1, %v54_v15, %v57_v19 }
 0x148   :  { %v110_v22 = vpop.eup %109  ;;  %v62_v23 = vsel %vm60_vm2, %v61_v20, %v59_v21 }
 0x149   :  { %v70_v24 = vadd.f32 1e-06, %v62_v23  ;;  %v64_v25 = vmul.f32 %v110_v22, %v55_v17 }
 0x14b   :  { %111 = vrcp.f32 %v70_v24  ;;  %v66_v27 = vsel %vm65_vm3, %v55_v17, %v64_v25 }
 0x14c   :  { %v69_v28 = vsel %vm67_vm4, %v68_v26, %v66_v27 }
 0x14d   :  { %v71_v29 = vadd.f32 1e-06, %v69_v28 }
 0x14f   :  { %113 = vrcp.f32 %v71_v29 }
 0x155   :  { %v112_v31 = vpop.eup %111 }
 0x156   :  { %v76_v32 = vmul.f32 %v112_v31, %v75_v30 }
 0x158   :  { %v78_v34 = vmul.f32 %v76_v32, %v43_v6 }
 0x159   :  { %v114_v35 = vpop.eup %113 }
 0x15a   :  { %v77_v36 = vmul.f32 %v114_v35, %v75_v30  ;;  %v82_v37 = vadd.f32 %v81_v33, %v78_v34 }
 0x15c   :  { %v79_v38 = vmul.f32 %v77_v36, %v44_v10  ;;  %84 = vst.msk [vmem:[#allocation7] sm:$0xff] %vm33_vm0, %v82_v37 }
 0x15e   :  { %v83_v39 = vadd.f32 %v81_v33, %v79_v38 }
 0x160   :  { %85 = vst.msk [vmem:[#allocation7 + $0x8] sm:$0xff] %vm33_vm0, %v83_v39 }
 0x161   :  { %148 = shalt.err (!%p145_p12)
}
 0x162   :  { %s149_s5 = scalar_lea.hbm %s232_s3, 256 }
 0x163   :  { %p150_p13 = scmp.ne.s32.totalorder %s232_s3, %s149_s5  ;;  %p153_p0 = scmp.lt.u32.totalorder %s149_s5, %s232_s3 }
 0x165   :  { %p155_p1 = pnand %p153_p0, %p150_p13 }
 0x167   :  { %158 = shalt.err (!%p155_p1)
}
 0x168   :  { %97 = dma.vmem_to_hbm [thread:$0]  %s92_s30, 256, %s232_s3, [#allocation6], %s164_s22, %s164_s22, %s165_s23  }
 0x169   :  { %161 = dma.done.wait [#allocation6], 256  }
 0x16a   :  { %162 = vsyncadd [#allocation6], 4294967040 }
 0x16b   :  { %101 = vsyncpa [#allocation5], 1 }
 0x16c   :  { %102 = vsyncpa [#allocation6], 1 }

</bundles_post_ra>
